<compile_context>
chip_gen: v7x
topology: tpu7x:2x2x1
jax: 0.10.0
libtpu: 0.0.40
codegen_flags: <defaults>
</compile_context>

<pallas_src>
import functools

import jax
import jax.numpy as jnp
from jax.experimental import pallas as pl
from jax.experimental.pallas import tpu as pltpu


# Per-input-block element budget for `pred` (~8 MiB at f32, ~4 MiB at bf16).
# Double-buffered by the pipeline plus a couple of fused f32 temporaries this
# stays comfortably inside a 48 MiB scoped-VMEM limit on every chip generation.
_BLOCK_ELEM_BUDGET = 2 * 1024 * 1024


def _label_smoothing_kernel(pred_ref, tgt_ref, out_ref, *,
                            confidence, off_value, num_real_classes,
                            total_rows, block_rows):
    """One grid step: partial label-smoothed CE sum over a block of rows."""
    i = pl.program_id(0)

    x = pred_ref[...]                                   # (TB, Cp) native dtype
    tgt = tgt_ref[...]                                  # (TB, 1) int32
    c_pad = x.shape[-1]

    # (1, Cp) class iota; broadcasting against (TB, 1) targets builds the mask
    # without materializing a (TB, Cp) int32 tensor.
    col = jax.lax.broadcasted_iota(jnp.int32, (1, c_pad), 1)

    # Numerically stable log-sum-exp along the class (lane) axis.  Padded lanes
    # hold a very negative logit -> exp underflows to exactly 0.
    m = jnp.max(x, axis=-1, keepdims=True).astype(jnp.float32)          # (TB, 1)
    lse = jnp.log(jnp.sum(jnp.exp(x.astype(jnp.float32) - m),
                          axis=-1, keepdims=True)) + m                  # (TB, 1)

    # Fused weighted reduction.  true_dist sums to 1, so
    #   per_row = sum_c(true_dist_c * (lse - x_c)) = lse - sum_c(w_c * x_c)
    # with w = confidence at target, off_value on real classes, 0 on pad lanes.
    base_w = jnp.where(col < num_real_classes,
                       jnp.float32(off_value), jnp.float32(0.0))        # (1, Cp)
    w = jnp.where(col == tgt, jnp.float32(confidence), base_w)          # (TB, Cp)
    wsum = jnp.sum(w * x.astype(jnp.float32), axis=-1, keepdims=True)   # (TB, 1)
    per_row = lse - wsum                                                # (TB, 1)

    # Mask out padded / replayed rows of a partial trailing block.  Their data
    # may be garbage (even NaN) but all reductions above are per-row and this
    # `where` selects rather than multiplies, so the garbage never propagates.
    row = jax.lax.broadcasted_iota(jnp.int32, per_row.shape, 0) + i * block_rows
    per_row = jnp.where(row < total_rows, per_row, 0.0)

    block_sum = jnp.sum(per_row)                                        # scalar

    # Lane-dense per-block partial tile; wrapper reads [i, 0, 0].
    out_ref[...] = jnp.zeros(out_ref.shape, jnp.float32) + block_sum


def label_smoothing_loss(pred, target, *, smoothing=0.1, block_rows=None):
    """pred: (N, C) float (any dtype), target: (N,) or (N, 1) int class ids."""
    n, c = pred.shape
    # PyTorch divides by (C-1); C==1 would divide by zero there, so reject it.
    assert c > 1, "LabelSmoothingLoss requires at least 2 classes."
    confidence = 1.0 - smoothing
    off_value = smoothing / (c - 1)

    # Pad the class axis to a multiple of 128 (lane width) for dense, unmasked
    # lane reductions (e.g. ImageNet C=1000 -> 1024).  Padded lanes get a very
    # negative logit so they contribute 0 to lse; the kernel zeroes their weight.
    if c > 128 and c % 128 != 0:
        c_pad = ((c + 127) // 128) * 128
        pad_val = max(-1e30, float(jnp.finfo(pred.dtype).min) * 0.5)
        pred = jnp.pad(pred, ((0, 0), (0, c_pad - c)), constant_values=pad_val)
    else:
        c_pad = c

    # Dtype-aware row alignment (sublane packing): f32 -> 8, bf16 -> 16, int8 -> 32.
    itemsize = jnp.dtype(pred.dtype).itemsize
    row_align = max(8, 32 // itemsize)

    # Auto-size the row tile from the element budget (pred kept in native dtype).
    if block_rows is None:
        block_rows = max(row_align, _BLOCK_ELEM_BUDGET // max(c_pad, 1))

    if n <= row_align:
        block_rows = n                        # single full-extent block (legal)
    else:
        block_rows = max(row_align, (block_rows // row_align) * row_align)
        # Keep >= 2 grid blocks so v7x's two TensorCores both engage and the
        # BlockSpec pipeline has prefetch/writeback to overlap with compute.
        two_blk = ((pl.cdiv(n, 2) + row_align - 1) // row_align) * row_align
        block_rows = min(block_rows, two_blk)

    num_blocks = pl.cdiv(n, block_rows)
    tgt = target.reshape(n, 1).astype(jnp.int32)

    kernel = functools.partial(
        _label_smoothing_kernel,
        confidence=confidence,
        off_value=off_value,
        num_real_classes=c,
        total_rows=n,
        block_rows=block_rows,
    )

    partials = pl.pallas_call(
        kernel,
        out_shape=jax.ShapeDtypeStruct((num_blocks, 1, 128), jnp.float32),
        grid_spec=pltpu.PrefetchScalarGridSpec(
            num_scalar_prefetch=0,
            grid=(num_blocks,),
            in_specs=[
                pl.BlockSpec((block_rows, c_pad), lambda i: (i, 0)),
                pl.BlockSpec((block_rows, 1), lambda i: (i, 0)),
            ],
            out_specs=pl.BlockSpec((1, 1, 128), lambda i: (i, 0, 0)),
        ),
        compiler_params=pltpu.CompilerParams(
            dimension_semantics=("parallel",),   # independent per-block partials
            vmem_limit_bytes=48 << 20,           # fits v7x (64 MiB physical)
        ),
    )(pred, tgt)

    # Final tiny reduction over per-block partial sums, then the batch mean.
    return jnp.sum(partials[:, 0, 0]) / jnp.float32(n)


def _reference(pred, target, smoothing=0.1):
    n, c = pred.shape
    logp = jax.nn.log_softmax(pred.astype(jnp.float32), axis=-1)
    true_dist = jnp.full((n, c), smoothing / (c - 1), dtype=jnp.float32)
    true_dist = true_dist.at[jnp.arange(n), target.reshape(-1)].set(1.0 - smoothing)
    return jnp.mean(jnp.sum(-true_dist * logp, axis=-1))


if __name__ == "__main__":
    key = jax.random.PRNGKey(0)
    k1, k2, k3, k4 = jax.random.split(key, 4)

    # Test 1: small, unpadded class axis (C <= 128 path), two row blocks.
    N1, C1 = 16, 32
    pred1 = jax.random.normal(k1, (N1, C1), dtype=jnp.float32)
    tgt1 = jax.random.randint(k2, (N1, 1), 0, C1, dtype=jnp.int32)
    out1 = jax.block_until_ready(label_smoothing_loss(pred1, tgt1, smoothing=0.1))
    ref1 = _reference(pred1, tgt1, smoothing=0.1)
    assert jnp.allclose(out1, ref1, atol=1e-4, rtol=1e-4), (out1, ref1)

    # Test 2: ImageNet-like class count (C=1000 -> padded to 1024 lanes) plus a
    # partial trailing row block (20 rows, 16-row tiles) to exercise masking.
    N2, C2 = 20, 1000
    pred2 = jax.random.normal(k3, (N2, C2), dtype=jnp.float32)
    tgt2 = jax.random.randint(k4, (N2,), 0, C2, dtype=jnp.int32)
    out2 = jax.block_until_ready(label_smoothing_loss(pred2, tgt2, smoothing=0.1))
    ref2 = _reference(pred2, tgt2, smoothing=0.1)
    assert jnp.allclose(out2, ref2, atol=1e-4, rtol=1e-4), (out2, ref2)

    print("KERNEL_OK")
</pallas_src>

<mosaic_0001>
module attributes {stable_mosaic.version = 11 : i64} {
  func.func @_label_smoothing_kernel(%arg0: i32, %arg1: memref<8x32xf32, #tpu.memory_space<vmem>>, %arg2: memref<8x1xi32, #tpu.memory_space<vmem>>, %arg3: memref<1x1x128xf32, #tpu.memory_space<vmem>>) attributes {dimension_semantics = [#tpu.dimension_semantics<parallel>], iteration_bounds = array<i64: 2>, scalar_prefetch = 0 : i64, scratch_operands = 0 : i64, tpu.core_type = #tpu.core_type<tc>, window_params = [{transform_indices = @transform_0, window_bounds = array<i64: 8, 32>}, {transform_indices = @transform_1, window_bounds = array<i64: 8, 1>}, {transform_indices = @transform_2, window_bounds = array<i64: 1, 1, 128>}]} {
    %c0 = arith.constant 0 : index
    %c0_0 = arith.constant 0 : index
    %0 = vector.load %arg1[%c0, %c0_0] : memref<8x32xf32, #tpu.memory_space<vmem>>, vector<8x32xf32>
    %c0_1 = arith.constant 0 : index
    %c0_2 = arith.constant 0 : index
    %1 = vector.load %arg2[%c0_1, %c0_2] : memref<8x1xi32, #tpu.memory_space<vmem>>, vector<8x1xi32>
    %2 = tpu.iota {dimensions = array<i32: 1>} : vector<1x32xi32>
    %cst = arith.constant dense<0xFF800000> : vector<8xf32>
    %3 = vector.multi_reduction <maximumf>, %0, %cst [1] : vector<8x32xf32> to vector<8xf32>
    %4 = vector.shape_cast %3 : vector<8xf32> to vector<8x1xf32>
    %5 = vector.broadcast %4 : vector<8x1xf32> to vector<8x32xf32>
    %6 = arith.subf %0, %5 : vector<8x32xf32>
    %7 = math.exp %6 : vector<8x32xf32>
    %cst_3 = arith.constant dense<0.000000e+00> : vector<8xf32>
    %8 = vector.multi_reduction <add>, %7, %cst_3 [1] : vector<8x32xf32> to vector<8xf32>
    %9 = vector.shape_cast %8 : vector<8xf32> to vector<8x1xf32>
    %10 = math.log %9 : vector<8x1xf32>
    %11 = arith.addf %10, %4 : vector<8x1xf32>
    %c32_i32 = arith.constant 32 : i32
    %12 = vector.broadcast %c32_i32 : i32 to vector<1x32xi32>
    %13 = arith.cmpi slt, %2, %12 : vector<1x32xi32>
    %cst_4 = arith.constant 0.0032258064 : f32
    %cst_5 = arith.constant 0.000000e+00 : f32
    %14 = vector.broadcast %cst_4 : f32 to vector<1x32xf32>
    %15 = vector.broadcast %cst_5 : f32 to vector<1x32xf32>
    %16 = arith.select %13, %14, %15 : vector<1x32xi1>, vector<1x32xf32>
    %17 = vector.broadcast %2 : vector<1x32xi32> to vector<8x32xi32>
    %18 = vector.broadcast %1 : vector<8x1xi32> to vector<8x32xi32>
    %19 = arith.cmpi eq, %17, %18 : vector<8x32xi32>
    %cst_6 = arith.constant 0.899999976 : f32
    %20 = vector.broadcast %cst_6 : f32 to vector<8x32xf32>
    %21 = vector.shape_cast %16 : vector<1x32xf32> to vector<1x32xf32>
    %22 = vector.broadcast %21 : vector<1x32xf32> to vector<8x32xf32>
    %23 = arith.select %19, %20, %22 : vector<8x32xi1>, vector<8x32xf32>
    %24 = arith.mulf %23, %0 : vector<8x32xf32>
    %cst_7 = arith.constant dense<0.000000e+00> : vector<8xf32>
    %25 = vector.multi_reduction <add>, %24, %cst_7 [1] : vector<8x32xf32> to vector<8xf32>
    %26 = vector.shape_cast %25 : vector<8xf32> to vector<8x1xf32>
    %27 = arith.subf %11, %26 : vector<8x1xf32>
    %28 = tpu.iota {dimensions = array<i32: 0>} : vector<8x1xi32>
    %c8_i32 = arith.constant 8 : i32
    %29 = arith.muli %arg0, %c8_i32 : i32
    %30 = vector.broadcast %29 : i32 to vector<8x1xi32>
    %31 = arith.addi %28, %30 : vector<8x1xi32>
    %c16_i32 = arith.constant 16 : i32
    %32 = vector.broadcast %c16_i32 : i32 to vector<8x1xi32>
    %33 = arith.cmpi slt, %31, %32 : vector<8x1xi32>
    %cst_8 = arith.constant 0.000000e+00 : f32
    %34 = vector.broadcast %cst_8 : f32 to vector<8x1xf32>
    %35 = arith.select %33, %27, %34 : vector<8x1xi1>, vector<8x1xf32>
    %36 = vector.shape_cast %35 : vector<8x1xf32> to vector<1x8x1xf32>
    %cst_9 = arith.constant dense<0.000000e+00> : vector<1xf32>
    %37 = vector.multi_reduction <add>, %36, %cst_9 [1, 2] : vector<1x8x1xf32> to vector<1xf32>
    %38 = vector.shape_cast %37 : vector<1xf32> to vector<1x1x1xf32>
    %39 = vector.extract %38[0, 0, 0] : f32 from vector<1x1x1xf32>
    %cst_10 = arith.constant 0.000000e+00 : f32
    %40 = vector.broadcast %cst_10 : f32 to vector<1x1x128xf32>
    %41 = vector.broadcast %39 : f32 to vector<1x1x128xf32>
    %42 = arith.addf %40, %41 : vector<1x1x128xf32>
    %c0_11 = arith.constant 0 : index
    %c0_12 = arith.constant 0 : index
    %c0_13 = arith.constant 0 : index
    %43 = vector.load %arg3[%c0_11, %c0_12, %c0_13] : memref<1x1x128xf32, #tpu.memory_space<vmem>>, vector<1x1x128xf32>
    tpu.vector_store %arg3[%c0_11, %c0_12, %c0_13], %42 {strides = array<i32>} : memref<1x1x128xf32, #tpu.memory_space<vmem>>, vector<1x1x128xf32>,
    return
  }
  func.func @transform_0(%arg0: i32) -> (i32, i32) {
    %c0_i32 = arith.constant 0 : i32
    %c0_i32_0 = arith.constant 0 : i32
    return %arg0, %c0_i32 : i32, i32
  }
  func.func @transform_1(%arg0: i32) -> (i32, i32) {
    %c0_i32 = arith.constant 0 : i32
    %c0_i32_0 = arith.constant 0 : i32
    return %arg0, %c0_i32 : i32, i32
  }
  func.func @transform_2(%arg0: i32) -> (i32, i32, i32) {
    %c0_i32 = arith.constant 0 : i32
    %c0_i32_0 = arith.constant 0 : i32
    %c0_i32_1 = arith.constant 0 : i32
    return %arg0, %c0_i32, %c0_i32_0 : i32, i32, i32
  }
}

</mosaic_0001>

<bundles_post_ra>
// kernel: tpu_custom_call.1
= control target key start
LH: loop header
LB: loop body
LE: loop exit
PB: predicated region body
PF: predicated region fallthrough
CT: control target
= control target key end

     0   :  { %7 = vsyncpa [#allocation3], 0  ;;  %s532_s0 = inlined_call_operand.vmem [shape: f32[16,32], index: 0, kind: input, shape index: {}]   ;;  %s533_s1 = inlined_call_operand.vmem [shape: s32[16,1], index: 1, kind: input, shape index: {}]   ;;  %s534_s2 = inlined_call_operand.hbm [shape: f32[2,1,128], index: 2, kind: output, shape index: {}]  }
   0x1   :  { %9 = vsyncpa [#allocation3 + $0x1], 0  ;;  %s425_s9 = smov 0   ;;  %s427_s10 = smov 0  }
   0x2   :  { %s429_s11 = smov 0   ;;  %s431_s12 = smov 0  }
   0x3 LB: > { %s446_s13 = sadd.s32 4294967295, %s405_s12   ;;  %s285_s14 = sadd.s32 4294967294, %s405_s12   ;;  %s405_s12 = sphi %s431_s12, %s540_s12   ;;  %s401_s11 = sphi %s429_s11, %s539_s11   ;;  %s397_s10 = sphi %s427_s10, %s538_s10   ;;  %s393_s9 = sphi %s425_s9, %s537_s9  }
   0x4   : > { %s450_s15 = sadd.s32 1, %s405_s12   ;;  %s74_s16 = sadd.s32 1, %s401_s11 }
   0x5   : > { %s71_s17 = ssub.s32 %s405_s12, %s450_s15  ;;  %p84_p0 = scmp.ne.s32.totalorder %s401_s11, %s397_s10 }
   0x6   : > { %p72_p1 = scmp.eq.s32.totalorder %s71_s17, 0  ;;  %p85_p2 = scmp.eq.s32.totalorder %s446_s13, 1 }
   0x7   : > { %p90_p3 = scmp.ne.s32.totalorder %s397_s10, %s393_s9  ;;  %p91_p4 = scmp.eq.s32.totalorder %s285_s14, 1 }
   0x8   : > { %s461_s18 = scalar_select %p72_p1, %s401_s11, %s74_s16  }
   0x9   : > { %p463_p5 = por %p85_p2, %p84_p0  ;;  %p467_p6 = por %p91_p4, %p90_p3 }
   0xa   : > { %p288_p7 = scmp.ge.s32.totalorder %s405_s12, 1  ;;  %p123_p8 = scmp.lt.s32.totalorder %s405_s12, 3 }
   0xc   : > { %p124_p9 = pnand %p288_p7, %p123_p8 }
   0xd   : > { %p147_p10 = scmp.lt.s32.totalorder (!%p124_p9), %s446_s13, 1  ;;  %v407_v0 = vmov (!%p124_p9), 0   ;;  %vm159_vm0 = vcmask (!%p124_p9), 261120   ;;  %v157_v4 = vlaneseq (!%p124_p9)  ;;  %v408_v9 = vmov (!%p124_p9), 0.0   ;;  %s291_s29 = sshll.u32 (!%p124_p9), %s446_s13, 3 }
   0xe   : > { %127 = sbr.rel (%p124_p9) target bundleno = 565 (0x235), region = 28  ;;  %338 = vset.pattern.permute.xlu0 (!%p124_p9), %v407_v0  ;;  %v187_v19 = vstv (!%p124_p9), %s291_s29  ;;  %vm191_vm4 = vcmask (!%p124_p9), 7168   ;;  %s145_s30 = sand.u32 (!%p124_p9), 1, %s397_s10  }
   0xf   : > { %v158_v7 = vand.u32 (!%p124_p9), 127, %v157_v4  ;;  %v185_v18 = vshrl.u32 (!%p124_p9), %v157_v4, 7  ;;  %s146_s3 = scalar_lea.vmem (!%p124_p9), [#allocation2], %s145_s30  ;;  %s292_s5 = sshll.u32 (!%p124_p9), %s446_s13, 4 }
  0x10   : > { %s218_s4 = sshll.u32 (!%p124_p9), %s146_s3, 4  ;;  %s492_s14 = scalar_lea.hbm (!%p124_p9), %s534_s2, %s292_s5  ;;  %s487_s4 = int_to_ptr.vmem [resolvable:$true] %s218_s4 }
  0x11   : > { %vm172_vm1 = vcmp.lt.s32.totalorder (!%p124_p9), %v158_v7, 32  ;;  %v188_v21 = vadd.s32 (!%p124_p9), %v187_v19, %v185_v18  ;;  %s206_s16 = scalar_lea.sflag (!%p124_p9), [#allocation3], %s145_s30  ;;  %s343_s17 = scalar_lea.vmem (!%p124_p9), %s487_s4, 16 }
  0x12   : > { %v173_v10 = vsel (!%p124_p9), %vm172_vm1, 0.0032258064, %v408_v9  ;;  %p344_p11 = scmp.ne.s32.totalorder (!%p124_p9), %s487_s4, %s343_s17 }
  0x13   : > { %vm189_vm3 = vcmp.lt.s32.totalorder (!%p124_p9), %v188_v21, 16 }
  0x14   : > { %p345_p12 = pnand (!%p124_p9), %p344_p11, %p463_p5 }
  0x15   : > { %s148_s21 = scalar_select %p147_p10, %s446_s13, 1 }
  0x16   : > { %p346_p13 = pneg %p345_p12  ;;  %s409_s13 = smov [#allocation2]  }
  0x17   : > { %s289_s22 = sshll.u32 %s148_s21, 3  ;;  %s347_s21 = sshll.u32 %s409_s13, 4  ;;  %s348_s21 = int_to_ptr.vmem [resolvable:$false] %s347_s21 }
  0x18   : > { %s150_s25 = scalar_lea.vmem %s532_s0, %s289_s22  ;;  %s154_s28 = scalar_lea.vmem %s533_s1, %s289_s22 }
  0x19   : > { %v155_v1 = vld [vmem:[%s150_s25] sm:$0xff]  ;;  %s349_s22 = scalar_lea.vmem %s348_s21, 32  ;;  %p350_p0 = scmp.lt.s32.totalorder %s487_s4, %s348_s21 }
  0x1a   : > { %v160_v2 = vsel %vm159_vm0, %v155_v1, -inf  ;;  %v156_v3 = vld [vmem:[%s154_s28] sm:$0xff]  ;;  %p351_p1 = scmp.lt.s32.totalorder %s349_s22, %s343_s17 }
  0x1b   : > { %161 = vmax.xlane.f32.xlu0 %v160_v2 }
  0x1c   : > { %p352_p2 = por %p351_p1, %p350_p0 }
  0x1e   : > { %p353_p3 = pnand %p352_p2, %p346_p13 }
  0x31   : > { %175 = vperm.xlu0 %338, %v156_v3  }
  0xa8   : > { %v162_v5 = vpop.xlane.xlu0 %161 }
  0xa9   : > { %v163_v6 = vsub.f32 %v155_v1, %v162_v5 }
  0xab   : > { %v164_v8 = vmul.f32 1.442695, %v163_v6 }
  0xad   : > { %339 = vpow2.f32 %v164_v8 }
  0xb0   : > { %v176_v11 = vpop.permute.xlu0 %175 }
  0xb1   : > { %vm177_vm2 = vcmp.eq.s32.totalorder %v158_v7, %v176_v11 }
  0xb2   : > { %v178_v12 = vsel %vm177_vm2, 0.9, %v173_v10 }
  0xb3   : > { %v179_v13 = vmul.f32 %v178_v12, %v155_v1 }
  0xb5   : > { %v180_v16 = vsel %vm159_vm0, %v179_v13, 0.0 }
  0xb7   : > { %v340_v14 = vpop.eup %339 }
  0xb8   : > { %v166_v15 = vsel %vm159_vm0, %v340_v14, 0.0 }
  0xb9   : > { %167 = vadd.xlane.f32.xlu1 %v166_v15 }
  0xbd   : > { %181 = vadd.xlane.f32.xlu1 %v180_v16 }
 0x146   : > { %v168_v17 = vpop.xlane.xlu1 %167 }
 0x147   : > { %341 = vlog2.f32 %v168_v17 }
 0x14a   : > { %v182_v23 = vpop.xlane.xlu1 %181 }
 0x151   : > { %v342_v20 = vpop.eup %341 }
 0x152   : > { %v170_v22 = vmul.f32 0.6931472, %v342_v20 }
 0x154   : > { %v171_v24 = vadd.f32 %v170_v22, %v162_v5 }
 0x156   : > { %v183_v25 = vsub.f32 %v171_v24, %v182_v23 }
 0x158   : > { %v190_v26 = vsel %vm189_vm3, %v183_v25, 0.0 }
 0x159   : > { %v192_v27 = vsel %vm191_vm4, %v190_v26, 0.0 }
 0x15a   : > { %193 = vadd.xlane.f32.xlu1 %v192_v27 }
 0x1e7   : > { %v194_v28 = vpop.xlane.xlu1 %193 }
 0x1e8   : > { %v195_v29 = vrot.slane %v194_v28, 4 }
 0x1ea   : > { %v196_v30 = vadd.f32 %v195_v29, %v194_v28 }
 0x1ec   : > { %v197_v31 = vrot.slane %v196_v30, 2 }
 0x1ee   : > { %v198_v32 = vadd.f32 %v197_v31, %v196_v30 }
 0x1f0   : > { %v199_v33 = vrot.slane %v198_v32, 1 }
 0x1f2   : > { %v200_v34 = vadd.f32 %v199_v33, %v198_v32 }
 0x1f4   : > { %295 = vpush %v200_v34 }
 0x225   : > { %s296_s6 = spop %295 }
 0x226   : > { %v202_v35 = vstv %s296_s6 }
 0x227   : > { %204 = vst [vmem:[%s146_s3] sm:$0x1] %v202_v35 }
 0x228   : > { %356 = shalt.err (!%p353_p3)
}
 0x229   : > { %s357_s23 = scalar_lea.hbm %s492_s14, 16  ;;  %s361_s26 = scalar_lea.hbm %s534_s2, 32 }
 0x22a   : > { %p358_p4 = scmp.ne.s32.totalorder %s492_s14, %s357_s23  ;;  %p362_p9 = scmp.lt.u32.totalorder %s492_s14, %s534_s2 }
 0x22b   : > { %p363_p10 = scmp.lt.u32.totalorder %s361_s26, %s357_s23  ;;  %p365_p12 = scmp.lt.u32.totalorder %s357_s23, %s492_s14 }
 0x22c   : > { %p359_p7 = pnand %p358_p4, %p463_p5 }
 0x22d   : > { %p364_p11 = por %p363_p10, %p362_p9 }
 0x22e   : > { %p360_p8 = pneg %p359_p7 }
 0x22f   : > { %p366_p13 = por %p365_p12, %p364_p11 }
 0x231   : > { %p367_p0 = pnand %p366_p13, %p360_p8 }
 0x233   : > { %370 = shalt.err (!%p367_p0)
}
 0x234   : > { %297 = dma.vmem_to_hbm [thread:$0]  (%p463_p5), %s487_s4, 16, %s492_s14, %s206_s16  }
 0x235 PF: > { %p303_p1 = scmp.ge.s32.totalorder %s405_s12, 2  ;;  %s230_s29 = sand.u32 1, %s393_s9  }
 0x236   : > { %s231_s30 = scalar_lea.sflag [#allocation3], %s230_s29 }
 0x237   : > { %p300_p2 = pnand %p303_p1, %p467_p6 }
 0x239   : > { %388 = dma.done.wait (!%p300_p2), %s231_s30, 16  }
 0x23a   : > { %390 = vsyncadd (!%p300_p2), %s231_s30, 4294967280  ;;  %p12_p3 = scmp.ge.s32.totalorder %s450_s15, 4   ;;  %s537_s9 = smov %s397_s10 }
 0x23b   : > { %s538_s10 = smov %s401_s11  ;;  %s539_s11 = smov %s461_s18 }
 0x23c   : > { %s540_s12 = smov %s450_s15  ;;  %14 = sbr.rel (!%p12_p3) target bundleno = 3 (0x3), region = 66 }
 0x243   :  { %235 = vsyncpa [#allocation3], 1 }
 0x244   :  { %237 = vsyncpa [#allocation3 + $0x1], 1 }

</bundles_post_ra>
